<compile_context>
chip_gen: v7x
topology: tpu7x:2x2x1
jax: 0.10.0
libtpu: 0.0.40
codegen_flags: <defaults>
</compile_context>

<pallas_src>
import functools

import jax
import jax.numpy as jnp
from jax.experimental import pallas as pl
from jax.experimental.pallas import tpu as pltpu

_NUM_CORES = 2                       # leading parallel grid axis (2x on v7x; harmless elsewhere)
_VMEM_BYTES_PER_INPUT_TILE = 2 << 20  # lane-padded VMEM budget per buffered input tile
_PALLAS_MIN_ELEMS = 1 << 16          # below this, plain jnp beats kernel launch overhead


def _round_up(x, m):
    return ((x + m - 1) // m) * m


def _sublane_min(dtype):
    # (8,128) tile for 4-byte, (16,128) for 2-byte, (32,128) for 1-byte dtypes.
    return max(8, 32 // jnp.dtype(dtype).itemsize)


def _max_tile_rows(dtype):
    # Last dim (<=128) is lane-padded to 128 in VMEM; rows * 128 * itemsize bytes.
    return max(8, _VMEM_BYTES_PER_INPUT_TILE // (128 * jnp.dtype(dtype).itemsize))


def _rmse_partial_kernel(pred_ref, target_ref, out_ref, *, tile_b, tiles_per_core,
                         rows_total, needs_mask):
    """Per-core streaming sum of squared diffs; out block (1, 8, C) is the accumulator."""
    c = pl.program_id(0)   # core slice (parallel)
    i = pl.program_id(1)   # row-tile within this core's slice (arbitrary/reduction)

    @pl.when(i == 0)
    def _():
        out_ref[...] = jnp.zeros_like(out_ref)

    d = pred_ref[...].astype(jnp.float32) - target_ref[...].astype(jnp.float32)
    if needs_mask:
        # Mask logical rows >= B (partial final tile and/or the clamped redundant
        # tile of the second core slice). Purely VPU; hidden under the DMA.
        base = (c * tiles_per_core + i) * tile_b
        row = base + jax.lax.broadcasted_iota(jnp.int32, d.shape, 0)
        d = jnp.where(row < rows_total, d, 0.0)
    sq = d * d
    # VPU tree-reduce the (tile_b, C) tile down to one (8, C) vreg-group; the
    # reshape splits the sublane dim exactly on the (8,128) tile boundary.
    partial = jnp.sum(sq.reshape(-1, 8, sq.shape[-1]), axis=0)
    out_ref[...] = out_ref[...] + partial[jnp.newaxis]


def _rmse_pallas(pred2d, target2d, tile_b=None):
    B, C = pred2d.shape
    sub = max(_sublane_min(pred2d.dtype), _sublane_min(target2d.dtype))

    if tile_b is None:
        cap = max(sub, min(_max_tile_rows(pred2d.dtype), _max_tile_rows(target2d.dtype)))
        n_at_cap = pl.cdiv(B, cap)
        tile_b = _round_up(pl.cdiv(B, n_at_cap), sub)   # divide evenly, round to sublanes
    else:
        tile_b = _round_up(max(int(tile_b), sub), sub)

    num_tiles = pl.cdiv(B, tile_b)
    tiles_per_core = pl.cdiv(num_tiles, _NUM_CORES)
    coverage = _NUM_CORES * tiles_per_core * tile_b
    needs_mask = coverage != B
    last_block = num_tiles - 1

    def in_index_map(c, i):
        # Clamp so no DMA block starts past the array; redundant/ragged rows are
        # zeroed in-kernel via the logical-row mask.
        return (jnp.minimum(c * tiles_per_core + i, last_block), 0)

    kernel = functools.partial(
        _rmse_partial_kernel,
        tile_b=tile_b,
        tiles_per_core=tiles_per_core,
        rows_total=B,
        needs_mask=needs_mask,
    )

    partials = pl.pallas_call(
        kernel,
        out_shape=jax.ShapeDtypeStruct((_NUM_CORES, 8, C), jnp.float32),
        grid=(_NUM_CORES, tiles_per_core),
        in_specs=[
            pl.BlockSpec((tile_b, C), in_index_map),
            pl.BlockSpec((tile_b, C), in_index_map),
        ],
        out_specs=pl.BlockSpec((1, 8, C), lambda c, i: (c, 0, 0)),
        compiler_params=pltpu.CompilerParams(
            dimension_semantics=("parallel", "arbitrary"),
            vmem_limit_bytes=32 * 1024 * 1024,
        ),
    )(pred2d, target2d)

    inv_n = 1.0 / float(B * C)
    return jnp.sqrt(jnp.sum(partials) * inv_n)


def get_loss(pred, target, *, use_pallas=None, tile_b=None):
    """RMSE between pred (B,21,3) and target (B,63); matches the torch module.

    torch's target.unsqueeze(-1).view(B,21,3) is a row-major regroup, so both
    tensors flatten row-major to identical element orderings; we feed them as
    contiguous (B, 63) slabs (free reshapes, no copies).
    """
    p = jnp.reshape(pred, (pred.shape[0], -1))
    t = jnp.reshape(target, (target.shape[0], -1))
    assert p.shape == t.shape, (p.shape, t.shape)
    n = int(p.size)
    if use_pallas is None:
        use_pallas = n >= _PALLAS_MIN_ELEMS
    if not use_pallas:
        # Tiny inputs: XLA fuses this fine; avoid Pallas launch overhead.
        d = p.astype(jnp.float32) - t.astype(jnp.float32)
        return jnp.sqrt(jnp.mean(d * d))
    return _rmse_pallas(p, t, tile_b=tile_b)


def _reference(pred, target):
    B = pred.shape[0]
    t = jnp.reshape(target, (B, 21, 3)).astype(jnp.float32)
    p = pred.astype(jnp.float32)
    return jnp.sqrt(jnp.mean((p - t) ** 2))


if __name__ == "__main__":
    key = jax.random.PRNGKey(0)
    k1, k2, k3, k4, k5, k6, k7, k8 = jax.random.split(key, 8)

    # 1) Small spec-consistent shapes: pred (B, 21, 3), target (B, 63).
    #    Single tile; second core slice is fully masked out.
    B = 2
    pred = jax.random.normal(k1, (B, 21, 3), dtype=jnp.float32)
    target = jax.random.normal(k2, (B, 63), dtype=jnp.float32)
    ref = _reference(pred, target)
    loss = get_loss(pred, target, use_pallas=True)
    jax.block_until_ready(loss)
    assert jnp.allclose(loss, ref, atol=1e-5, rtol=1e-5), (loss, ref)

    # 2) Multi-step streaming path, exact coverage (no mask), both core slices busy.
    B2 = 64
    pred2 = jax.random.normal(k3, (B2, 21, 3), dtype=jnp.float32)
    target2 = jax.random.normal(k4, (B2, 63), dtype=jnp.float32)
    loss2 = get_loss(pred2, target2, use_pallas=True, tile_b=8)
    jax.block_until_ready(loss2)
    ref2 = _reference(pred2, target2)
    assert jnp.allclose(loss2, ref2, atol=1e-5, rtol=1e-5), (loss2, ref2)

    # 3) Multi-step + ragged tail: mask path and clamped redundant block exercised.
    B3 = 100
    pred3 = jax.random.normal(k5, (B3, 21, 3), dtype=jnp.float32)
    target3 = jax.random.normal(k6, (B3, 63), dtype=jnp.float32)
    loss3 = get_loss(pred3, target3, use_pallas=True, tile_b=16)
    jax.block_until_ready(loss3)
    ref3 = _reference(pred3, target3)
    assert jnp.allclose(loss3, ref3, atol=1e-5, rtol=1e-5), (loss3, ref3)

    # 4) bf16 inputs stay bf16 through the DMA (dtype-aware sublane minimum = 16).
    B4 = 64
    pred4 = jax.random.normal(k7, (B4, 21, 3), dtype=jnp.bfloat16)
    target4 = jax.random.normal(k8, (B4, 63), dtype=jnp.bfloat16)
    loss4 = get_loss(pred4, target4, use_pallas=True)
    jax.block_until_ready(loss4)
    ref4 = _reference(pred4, target4)
    assert jnp.allclose(loss4, ref4, atol=3e-2, rtol=3e-2), (loss4, ref4)

    # 5) Auto-dispatch: tiny inputs take the plain-jnp fallback path.
    loss5 = get_loss(pred, target)
    jax.block_until_ready(loss5)
    assert jnp.allclose(loss5, ref, atol=1e-5, rtol=1e-5), (loss5, ref)

    print("KERNEL_OK")
</pallas_src>

<mosaic_0001>
module attributes {stable_mosaic.version = 11 : i64} {
  func.func @_rmse_partial_kernel(%arg0: i32, %arg1: i32, %arg2: memref<8x63xf32, #tpu.memory_space<vmem>>, %arg3: memref<8x63xf32, #tpu.memory_space<vmem>>, %arg4: memref<1x8x63xf32, #tpu.memory_space<vmem>>) attributes {dimension_semantics = [#tpu.dimension_semantics<parallel>, #tpu.dimension_semantics<arbitrary>], iteration_bounds = array<i64: 2, 1>, scalar_prefetch = 0 : i64, scratch_operands = 0 : i64, tpu.core_type = #tpu.core_type<tc>, window_params = [{transform_indices = @transform_0, window_bounds = array<i64: 8, 63>}, {transform_indices = @transform_1, window_bounds = array<i64: 8, 63>}, {transform_indices = @transform_2, window_bounds = array<i64: 1, 8, 63>}]} {
    %c0_i32 = arith.constant 0 : i32
    %0 = arith.cmpi eq, %arg1, %c0_i32 : i32
    %1 = arith.extui %0 : i1 to i32
    %c0_i32_0 = arith.constant 0 : i32
    %2 = arith.cmpi ne, %1, %c0_i32_0 : i32
    scf.if %2 {
      %cst_11 = arith.constant 0.000000e+00 : f32
      %23 = vector.broadcast %cst_11 : f32 to vector<1x8x63xf32>
      %c0_12 = arith.constant 0 : index
      %c0_13 = arith.constant 0 : index
      %c0_14 = arith.constant 0 : index
      %24 = vector.load %arg4[%c0_12, %c0_13, %c0_14] : memref<1x8x63xf32, #tpu.memory_space<vmem>>, vector<1x8x63xf32>
      tpu.vector_store %arg4[%c0_12, %c0_13, %c0_14], %23 {strides = array<i32>} : memref<1x8x63xf32, #tpu.memory_space<vmem>>, vector<1x8x63xf32>,
    } else {
    }
    %c0 = arith.constant 0 : index
    %c0_1 = arith.constant 0 : index
    %3 = vector.load %arg2[%c0, %c0_1] : memref<8x63xf32, #tpu.memory_space<vmem>>, vector<8x63xf32>
    %c0_2 = arith.constant 0 : index
    %c0_3 = arith.constant 0 : index
    %4 = vector.load %arg3[%c0_2, %c0_3] : memref<8x63xf32, #tpu.memory_space<vmem>>, vector<8x63xf32>
    %5 = arith.subf %3, %4 : vector<8x63xf32>
    %c1_i32 = arith.constant 1 : i32
    %6 = arith.muli %arg0, %c1_i32 : i32
    %7 = arith.addi %6, %arg1 : i32
    %c8_i32 = arith.constant 8 : i32
    %8 = arith.muli %7, %c8_i32 : i32
    %9 = tpu.iota {dimensions = array<i32: 0>} : vector<8x63xi32>
    %10 = vector.broadcast %8 : i32 to vector<8x63xi32>
    %11 = arith.addi %10, %9 : vector<8x63xi32>
    %c2_i32 = arith.constant 2 : i32
    %12 = vector.broadcast %c2_i32 : i32 to vector<8x63xi32>
    %13 = arith.cmpi slt, %11, %12 : vector<8x63xi32>
    %cst = arith.constant 0.000000e+00 : f32
    %14 = vector.broadcast %cst : f32 to vector<8x63xf32>
    %15 = arith.select %13, %5, %14 : vector<8x63xi1>, vector<8x63xf32>
    %16 = arith.mulf %15, %15 : vector<8x63xf32>
    %17 = vector.shape_cast %16 : vector<8x63xf32> to vector<1x8x63xf32>
    %cst_4 = arith.constant dense<0.000000e+00> : vector<8x63xf32>
    %18 = vector.multi_reduction <add>, %17, %cst_4 [0] : vector<1x8x63xf32> to vector<8x63xf32>
    %c0_5 = arith.constant 0 : index
    %c0_6 = arith.constant 0 : index
    %c0_7 = arith.constant 0 : index
    %19 = vector.load %arg4[%c0_5, %c0_6, %c0_7] : memref<1x8x63xf32, #tpu.memory_space<vmem>>, vector<1x8x63xf32>
    %20 = vector.shape_cast %18 : vector<8x63xf32> to vector<1x8x63xf32>
    %21 = arith.addf %19, %20 : vector<1x8x63xf32>
    %c0_8 = arith.constant 0 : index
    %c0_9 = arith.constant 0 : index
    %c0_10 = arith.constant 0 : index
    %22 = vector.load %arg4[%c0_8, %c0_9, %c0_10] : memref<1x8x63xf32, #tpu.memory_space<vmem>>, vector<1x8x63xf32>
    tpu.vector_store %arg4[%c0_8, %c0_9, %c0_10], %21 {strides = array<i32>} : memref<1x8x63xf32, #tpu.memory_space<vmem>>, vector<1x8x63xf32>,
    return
  }
  func.func @transform_0(%arg0: i32, %arg1: i32) -> (i32, i32) {
    %c1_i32 = arith.constant 1 : i32
    %0 = arith.muli %arg0, %c1_i32 : i32
    %1 = arith.addi %0, %arg1 : i32
    %c0_i32 = arith.constant 0 : i32
    %2 = arith.minsi %1, %c0_i32 : i32
    %c0_i32_0 = arith.constant 0 : i32
    %c0_i32_1 = arith.constant 0 : i32
    return %2, %c0_i32_0 : i32, i32
  }
  func.func @transform_1(%arg0: i32, %arg1: i32) -> (i32, i32) {
    %c1_i32 = arith.constant 1 : i32
    %0 = arith.muli %arg0, %c1_i32 : i32
    %1 = arith.addi %0, %arg1 : i32
    %c0_i32 = arith.constant 0 : i32
    %2 = arith.minsi %1, %c0_i32 : i32
    %c0_i32_0 = arith.constant 0 : i32
    %c0_i32_1 = arith.constant 0 : i32
    return %2, %c0_i32_0 : i32, i32
  }
  func.func @transform_2(%arg0: i32, %arg1: i32) -> (i32, i32, i32) {
    %c0_i32 = arith.constant 0 : i32
    %c0_i32_0 = arith.constant 0 : i32
    %c0_i32_1 = arith.constant 0 : i32
    return %arg0, %c0_i32, %c0_i32_0 : i32, i32, i32
  }
}

</mosaic_0001>

<bundles_post_ra>
// kernel: tpu_custom_call.1
= control target key start
LH: loop header
LB: loop body
LE: loop exit
PB: predicated region body
PF: predicated region fallthrough
CT: control target
= control target key end

     0   :  { %7 = vsyncpa [#allocation3], 0  ;;  %s799_s0 = inlined_call_operand.hbm [shape: f32[2,63], index: 0, kind: input, shape index: {}]   ;;  %s800_s1 = inlined_call_operand.vmem [shape: f32[2,63], index: 1, kind: input, shape index: {}]   ;;  %s801_s2 = inlined_call_operand.hbm [shape: f32[2,8,63], index: 2, kind: output, shape index: {}]  }
   0x1   :  { %9 = vsyncpa [#allocation3 + $0x1], 0 }
   0x2   :  { %10 = vsyncpa [#allocation4], 0 }
   0x3   :  { %12 = vsyncpa [#allocation4 + $0x1], 0  ;;  %s633_s9 = smov 0   ;;  %s635_s10 = smov 0  }
   0x4   :  { %s637_s11 = smov 0   ;;  %s639_s12 = smov 0  }
   0x5   :  { %s641_s13 = smov 0   ;;  %s643_s14 = smov 0  }
   0x6   :  { %s645_s15 = smov 0   ;;  %s647_s16 = smov 0  }
   0x7 LB: > { %s373_s17 = sadd.s32 4294967295, %s611_s16   ;;  %s374_s18 = sadd.s32 4294967294, %s611_s16   ;;  %s611_s16 = sphi %s647_s16, %s18_s16   ;;  %s607_s15 = sphi %s645_s15, %s811_s15   ;;  %s603_s14 = sphi %s643_s14, %s810_s14   ;;  %s599_s13 = sphi %s641_s13, %s789_s13   ;;  %s595_s12 = sphi %s639_s12, %s809_s12   ;;  %s591_s11 = sphi %s637_s11, %s808_s11   ;;  %s587_s10 = sphi %s635_s10, %s807_s10   ;;  %s583_s9 = sphi %s633_s9, %s806_s9  }
   0x8   : > { %s30_s19 = sadd.s32 1, %s607_s15  ;;  %p580_p1 = scmp.ne.s32.totalorder %s599_s13, 0 }
   0x9   : > { %p32_p0 = scmp.ge.s32.totalorder %s30_s19, 2  ;;  %p51_p2 = scmp.eq.s32.totalorder %s611_s16, 0 }
   0xa   : > { %p56_p3 = scmp.ne.s32.totalorder %s599_s13, %s595_s12  ;;  %p57_p5 = scmp.eq.s32.totalorder %s373_s17, 0 }
   0xb   : > { %s813_s19 = smov (%p32_p0, %s30_s19), 0  ;;  %p679_p4 = por %p580_p1, %p51_p2 }
   0xc   : > { %p683_p6 = por %p57_p5, %p56_p3  ;;  %s98_s22 = ssub.s32 %s607_s15, %s813_s19 }
   0xd   : > { %p99_p7 = scmp.eq.s32.totalorder %s98_s22, 0  ;;  %s101_s23 = sadd.s32 1, %s591_s11 }
   0xe   : > { %p111_p8 = scmp.ne.s32.totalorder %s591_s11, %s587_s10  ;;  %p112_p9 = scmp.eq.s32.totalorder %s373_s17, 1 }
   0xf   : > { %s691_s24 = scalar_select %p99_p7, %s591_s11, %s101_s23  }
  0x10   : > { %p117_p10 = scmp.ne.s32.totalorder %s587_s10, %s583_s9  ;;  %p118_p11 = scmp.eq.s32.totalorder %s374_s18, 1 }
  0x11   : > { %p697_p12 = por %p112_p9, %p111_p8  ;;  %p376_p0 = scmp.ge.s32.totalorder %s611_s16, 2 }
  0x12   : > { %p701_p13 = por %p118_p11, %p117_p10 }
  0x13   : > { %134 = sbr.rel (%p376_p0) target bundleno = 53 (0x35), region = 16 }
  0x1a   : > { %137 = sbr.rel (!%p679_p4) target bundleno = 53 (0x35), region = 20 }
  0x21   : > { %151 = vsyncadd [#allocation3], 96  ;;  %s613_s27 = smov [#allocation2]   ;;  %s478_s3 = scalar_lea.hbm %s799_s0, 32 }
  0x22   : > { %s156_s28 = sshll.u32 %s613_s27, 4  ;;  %p479_p1 = scmp.ne.s32.totalorder %s799_s0, %s478_s3  ;;  %s157_s28 = int_to_ptr.vmem [resolvable:$true] %s156_s28 }
  0x23   : > { %p484_p2 = scmp.lt.u32.totalorder %s478_s3, %s478_s3  ;;  %p486_p3 = scmp.lt.u32.totalorder %s478_s3, %s799_s0 }
  0x25   : > { %p487_p5 = por %p486_p3, %p484_p2 }
  0x27   : > { %p488_p7 = pnand %p487_p5, %p479_p1 }
  0x29   : > { %491 = shalt.err (!%p488_p7)
}
  0x2a   : > { %s492_s8 = scalar_lea.vmem %s157_s28, 32  ;;  %s498_s12 = scalar_lea.vmem %s157_s28, 256 }
  0x2b   : > { %p493_p4 = scmp.ne.s32.totalorder %s157_s28, %s492_s8  ;;  %p499_p8 = scmp.lt.s32.totalorder %s157_s28, %s157_s28 }
  0x2c   : > { %p500_p9 = scmp.lt.s32.totalorder %s498_s12, %s492_s8 }
  0x2e   : > { %p501_p10 = por %p500_p9, %p499_p8 }
  0x30   : > { %p502_p11 = pnand %p501_p10, %p493_p4 }
  0x32   : > { %505 = shalt.err (!%p502_p11)
}
  0x33   : > { %s614_s17 = smov 32   ;;  %s615_s18 = smov 2  }
  0x34   : > { %162 = dma.hbm_to_vmem [thread:$0]  %s799_s0, 32, %s157_s28, [#allocation3], %s614_s17, %s614_s17, %s615_s18  }
  0x35 PF: > { %p384_p1 = scmp.ge.s32.totalorder %s611_s16, 1  ;;  %p183_p2 = scmp.lt.s32.totalorder %s611_s16, 3 }
  0x37   : > { %p184_p3 = pnand %p384_p1, %p183_p2 }
  0x38   : > { %s189_s23 = sand.u32 (!%p184_p3), 1, %s599_s13  }
  0x39   : > { %187 = sbr.rel (%p184_p3) target bundleno = 97 (0x61), region = 28  ;;  %s385_s27 = sshll.u32 (!%p184_p3), %s189_s23, 3 }
  0x3a   : > { %s190_s29 = scalar_lea.sflag (!%p184_p3), [#allocation3], %s189_s23  ;;  %s193_s30 = scalar_lea.vmem (!%p184_p3), [#allocation2], %s385_s27 }
  0x40   : > { %571 = dma.done.wait (%p683_p6), %s190_s29, 128  }
  0x41   : > { %573 = vsyncadd (%p683_p6), %s190_s29, 4294967168  ;;  %s221_s28 = sand.u32 1, %s587_s10   ;;  %p231_p5 = scmp.lt.s32.totalorder %s603_s14, 0  ;;  %vm250_vm0 = vcmask 515072   ;;  %v257_v0 = vlaneseq  ;;  %v616_v1 = vmov 0.0   ;;  %v252_v5 = vld [vmem:[%s193_s30] sm:$0xff] }
  0x42   : > { %s386_s3 = sshll.u32 %s221_s28, 3  ;;  %s389_s4 = sshll.u32 %s603_s14, 3 }
  0x43   : > { %s232_s5 = scalar_select %p231_p5, %s603_s14, 0  ;;  %v258_v2 = vshrl.u32 %v257_v0, 7  ;;  %v259_v3 = vstv %s389_s4 }
  0x44   : > { %s223_s6 = scalar_lea.vmem [#allocation5], %s386_s3  ;;  %s391_s18 = sshll.u32 %s603_s14, 7 }
  0x45   : > { %251 = vst.msk [vmem:[%s223_s6] sm:$0xff] %vm250_vm0, %v616_v1  ;;  %s387_s21 = sshll.u32 %s232_s5, 2  ;;  %v260_v4 = vadd.s32 %v259_v3, %v258_v2  ;;  %s283_s20 = sshll.u32 %s223_s6, 4  ;;  %s745_s20 = int_to_ptr.vmem [resolvable:$true] %s283_s20 }
  0x46   : > { %p236_p6 = scmp.lt.s32.totalorder %s387_s21, 0  ;;  %s743_s27 = scalar_lea.hbm %s801_s2, %s391_s18 }
  0x47   : > { %vm261_vm1 = vcmp.lt.s32.totalorder %v260_v4, 2  ;;  %s270_s29 = scalar_lea.sflag [#allocation4], %s221_s28  ;;  %s506_s30 = scalar_lea.vmem %s745_s20, 128 }
  0x48   : > { %s815_s21 = smov (!%p236_p6, %s387_s21), 0  ;;  %p507_p7 = scmp.ne.s32.totalorder %s745_s20, %s506_s30 }
  0x49   : > { %s388_s7 = sshll.u32 %s815_s21, 1  ;;  %s617_s14 = smov [#allocation5]  }
  0x4a   : > { %s239_s17 = scalar_lea.vmem %s800_s1, %s388_s7  ;;  %p508_p4 = pnand %p507_p7, %p697_p12 }
  0x4b   : > { %v253_v6 = vld [vmem:[%s239_s17] sm:$0xff]  ;;  %s510_s3 = sshll.u32 %s617_s14, 4  ;;  %s511_s3 = int_to_ptr.vmem [resolvable:$false] %s510_s3 }
  0x4c   : > { %v254_v7 = vsub.f32 %v252_v5, %v253_v6  ;;  %v265_v9 = vld [vmem:[%s223_s6] sm:$0xff]  ;;  %p509_p8 = pneg %p508_p4  ;;  %s512_s4 = scalar_lea.vmem %s511_s3, 256 }
  0x4d   : > { %p513_p9 = scmp.lt.s32.totalorder %s745_s20, %s511_s3  ;;  %p514_p10 = scmp.lt.s32.totalorder %s512_s4, %s506_s30 }
  0x4e   : > { %v262_v8 = vsel %vm261_vm1, %v254_v7, 0.0 }
  0x4f   : > { %v263_v10 = vmul.f32 %v262_v8, %v262_v8  ;;  %p515_p11 = por %p514_p10, %p513_p9 }
  0x51   : > { %v266_v11 = vadd.f32 %v265_v9, %v263_v10  ;;  %p516_p1 = pnand %p515_p11, %p509_p8 }
  0x53   : > { %268 = vst.msk [vmem:[%s223_s6] sm:$0xff] %vm250_vm0, %v266_v11 }
  0x54   : > { %519 = shalt.err (!%p516_p1)
}
  0x55   : > { %s520_s28 = scalar_lea.hbm %s743_s27, 128  ;;  %s524_s21 = scalar_lea.hbm %s801_s2, 256 }
  0x56   : > { %p521_p2 = scmp.ne.s32.totalorder %s743_s27, %s520_s28  ;;  %p525_p6 = scmp.lt.u32.totalorder %s743_s27, %s801_s2 }
  0x57   : > { %p526_p7 = scmp.lt.u32.totalorder %s524_s21, %s520_s28  ;;  %p528_p8 = scmp.lt.u32.totalorder %s520_s28, %s743_s27 }
  0x58   : > { %p522_p3 = pnand %p521_p2, %p697_p12 }
  0x59   : > { %p527_p4 = por %p526_p7, %p525_p6 }
  0x5a   : > { %p523_p5 = pneg %p522_p3 }
  0x5b   : > { %p529_p9 = por %p528_p8, %p527_p4 }
  0x5d   : > { %p530_p10 = pnand %p529_p9, %p523_p5 }
  0x5f   : > { %533 = shalt.err (!%p530_p10)
}
  0x60   : > { %396 = dma.vmem_to_hbm [thread:$0]  (%p697_p12), %s745_s20, 128, %s743_s27, %s270_s29  }
  0x61 PF: > { %s295_s12 = sand.u32 1, %s583_s9   ;;  %p399_p11 = pnand %p376_p0, %p701_p13 }
  0x62   : > { %s296_s17 = scalar_lea.sflag [#allocation4], %s295_s12 }
  0x63   : > { %575 = dma.done.wait (!%p399_p11), %s296_s17, 128  }
  0x64   : > { %577 = vsyncadd (!%p399_p11), %s296_s17, 4294967168  ;;  %s18_s16 = sadd.s32 1, %s611_s16   ;;  %s806_s9 = smov %s587_s10 }
  0x65   : > { %p15_p1 = scmp.ge.s32.totalorder %s18_s16, 4   ;;  %s807_s10 = smov %s591_s11 }
  0x66   : > { %s808_s11 = smov %s691_s24  ;;  %s809_s12 = smov %s599_s13 }
  0x67   : > { %s789_s13 = smov 0   ;;  %s810_s14 = smov %s607_s15 }
  0x68   : > { %s811_s15 = smov %s813_s19  ;;  %17 = sbr.rel (!%p15_p1) target bundleno = 7 (0x7), region = 80 }
  0x6f   :  { %301 = vsyncpa [#allocation3], 1 }
  0x70   :  { %303 = vsyncpa [#allocation3 + $0x1], 1 }
  0x71   :  { %304 = vsyncpa [#allocation4], 1 }
  0x72   :  { %306 = vsyncpa [#allocation4 + $0x1], 1 }

</bundles_post_ra>
